<compile_context>
chip_gen: v7x
topology: tpu7x:2x2x1
jax: 0.10.0
libtpu: 0.0.40
codegen_flags: <defaults>
</compile_context>

<pallas_src>
import functools

import jax
import jax.numpy as jnp
from jax.experimental import pallas as pl
from jax.experimental.pallas import tpu as pltpu


def _round_up(x, n):
    return ((x + n - 1) // n) * n


def _conv_bn_relu_kernel(x_cur_ref, x_halo_ref, w_ref, scale_ref, shift_ref,
                         o_ref, *, K, Wp, dil, chunk, n_chunks):
    # x_cur_ref : (1, Cin_p, Lt)      bf16 current spatial tile (flattened domain)
    # x_halo_ref: (1, Cin_p, Lh)      bf16 first Lh columns of the NEXT tile (halo)
    # w_ref     : (Cout, K*K*Cin_p)   bf16 stacked conv taps (matmul LHS)
    # scale_ref : (Cout, 1)           f32 folded BN scale (column -> free lane bcast)
    # shift_ref : (Cout, 1)           f32 folded BN shift + scaled conv bias
    # o_ref     : (1, Cout, Lt)       f32 lane-dense output tile (Lt % 128 == 0)
    x_win = jnp.concatenate([x_cur_ref[0], x_halo_ref[0]], axis=-1)  # (Cin_p, Lt+Lh)
    w = w_ref[...]
    scale = scale_ref[...]
    shift = shift_ref[...]

    for c in range(n_chunks):            # static; each chunk's values die at its store
        base = c * chunk
        taps = []
        for kh in range(K):
            for kw in range(K):
                s = kh * dil * Wp + kw * dil          # static lane offset of this tap
                taps.append(x_win[:, base + s: base + s + chunk])     # (Cin_p, chunk)
        rhs = taps[0] if len(taps) == 1 else jnp.concatenate(taps, axis=0)
        # One wide-contraction MXU matmul covering all K*K taps.
        y = jnp.dot(w, rhs, preferred_element_type=jnp.float32)       # (Cout, chunk)
        y = y * scale + shift                                          # fused BN+bias
        o_ref[0, :, base: base + chunk] = jnp.maximum(y, 0.0).astype(o_ref.dtype)


def conv_bn_relu_2d(x, w, bias, gamma, beta, run_mean, run_var, *,
                    padding, dilation=1, eps=1e-5):
    """Fused Conv2d(+bias, stride 1) -> BatchNorm2d(eval) -> ReLU.

    x: (B, Cin, H, W) f32   w: (Cout, Cin, K, K) f32
    bias / gamma / beta / run_mean / run_var: (Cout,) f32
    """
    B, Cin, H, W = x.shape
    Cout, Cin_w, K, K2 = w.shape
    assert Cin_w == Cin and K == K2
    d, P = dilation, padding

    H_out = H + 2 * P - d * (K - 1)
    W_out = W + 2 * P - d * (K - 1)
    assert H_out > 0 and W_out > 0
    Hp, Wp = H + 2 * P, W + 2 * P

    # --- spatial tiling over the flattened padded domain --------------------
    # Output pixel (h, w) lives at flat index h*Wp + w; tap (kh, kw) reads
    # offset s = kh*d*Wp + kw*d, so a tile needs max_s halo columns beyond it.
    max_s = (K - 1) * d * (Wp + 1)
    Lh = max(128, _round_up(max_s, 128))          # halo block width, lane-aligned
    L_cover = H_out * Wp                          # flat span holding all valid outputs

    Cin_p = _round_up(Cin, 16)                    # sublane/bf16-packing aligned channels

    # Spatial tile Lt = m*Lh, sized so one step's x+out slab is ~8 MiB.
    bytes_per_col = Cin_p * 2 + Cout * 4
    m = max(1, min((8 << 20) // max(Lh * bytes_per_col, 1),
                   pl.cdiv(L_cover, Lh), 16))
    Lt = m * Lh
    n_L = pl.cdiv(L_cover, Lt)
    L_total = n_L * Lt

    # In-kernel lane chunk: bound the live f32 result tile and stacked-RHS temp.
    chunk_m = 1
    for cm in range(1, m + 1):
        if (m % cm == 0 and Cout * cm * Lh * 4 <= (256 << 10)
                and K * K * Cin_p * cm * Lh * 2 <= (2 << 20)):
            chunk_m = cm
    chunk = chunk_m * Lh
    n_chunks = m // chunk_m

    # --- inputs: ONE pad (H extended to cover the flat halo), flatten, bf16 --
    F_need = L_total + Lh                          # kernel never reads past this
    Hp_ext = pl.cdiv(F_need, Wp)                   # >= Hp by construction
    x_pad = jnp.pad(x, ((0, 0), (0, Cin_p - Cin),
                        (P, P + (Hp_ext - Hp)), (P, P)))
    x_flat = x_pad.reshape(B, Cin_p, Hp_ext * Wp).astype(jnp.bfloat16)

    # Stacked LHS: column order (kh*K + kw)*Cin_p + cin, matching the RHS stack.
    w_p = jnp.pad(w, ((0, 0), (0, Cin_p - Cin), (0, 0), (0, 0)))
    w_lhs = jnp.transpose(w_p, (0, 2, 3, 1)).reshape(Cout, K * K * Cin_p)
    w_lhs = w_lhs.astype(jnp.bfloat16)

    # Fold BatchNorm (running stats) + conv bias into per-channel columns.
    scale = gamma / jnp.sqrt(run_var + eps)
    shift = beta + (bias - run_mean) * scale
    scale_c = scale.reshape(Cout, 1).astype(jnp.float32)
    shift_c = shift.reshape(Cout, 1).astype(jnp.float32)

    # --- VMEM budget: explicit limit, capped at 48 MiB (v7x headroom) -------
    step_bytes = Cin_p * (Lt + Lh) * 2 + Cout * Lt * 4            # pipelined buffers
    temp_bytes = (Cin_p * (Lt + Lh) * 2 + K * K * Cin_p * chunk * 2
                  + Cout * chunk * 4)                             # in-kernel temps
    resident_bytes = 2 * (Cout * K * K * Cin_p * 2 + 2 * Cout * 4)
    needed = 2 * step_bytes + temp_bytes + resident_bytes + (2 << 20)
    vmem_limit = int(min(48 << 20, max(24 << 20, 2 * needed)))

    kernel = functools.partial(_conv_bn_relu_kernel, K=K, Wp=Wp, dil=d,
                               chunk=chunk, n_chunks=n_chunks)

    flops = 2 * B * Cout * Cin * K * K * H_out * W_out
    bytes_accessed = int(x_flat.size * 2 + B * Cout * L_total * 4 + w_lhs.size * 2)

    out_flat = pl.pallas_call(
        kernel,
        out_shape=jax.ShapeDtypeStruct((B, Cout, L_total), jnp.float32),
        grid_spec=pltpu.PrefetchScalarGridSpec(
            num_scalar_prefetch=0,
            grid=(B, n_L),
            in_specs=[
                # current spatial tile of x
                pl.BlockSpec((1, Cin_p, Lt), lambda b, j: (b, 0, j)),
                # halo: first Lh columns of the NEXT tile (same array, 2nd spec)
                pl.BlockSpec((1, Cin_p, Lh), lambda b, j: (b, 0, (j + 1) * m)),
                # resident operands (constant index -> no re-DMA between steps).
                # NOTE: pipeline_mode=pl.Buffered(1) would single-buffer these,
                # saving one weight copy in VMEM; left at default for portability.
                pl.BlockSpec((Cout, K * K * Cin_p), lambda b, j: (0, 0)),
                pl.BlockSpec((Cout, 1), lambda b, j: (0, 0)),
                pl.BlockSpec((Cout, 1), lambda b, j: (0, 0)),
            ],
            out_specs=pl.BlockSpec((1, Cout, Lt), lambda b, j: (b, 0, j)),
        ),
        compiler_params=pltpu.CompilerParams(
            dimension_semantics=("parallel", "parallel"),
            vmem_limit_bytes=vmem_limit),
        cost_estimate=pl.CostEstimate(
            flops=flops, transcendentals=0, bytes_accessed=bytes_accessed),
    )(x_flat, x_flat, w_lhs, scale_c, shift_c)

    # Un-flatten: prefix -> (H_out, Wp) rows -> drop the Wp-W_out halo columns.
    # (One fused strided-copy pass in XLA.)
    out = out_flat[:, :, :H_out * Wp].reshape(B, Cout, H_out, Wp)[:, :, :, :W_out]
    return out


def _reference(x, w, bias, gamma, beta, run_mean, run_var, *,
               padding, dilation, eps):
    # Pure-JAX reference mirroring PyTorch Conv2d -> BatchNorm2d(eval) -> ReLU.
    y = jax.lax.conv_general_dilated(
        x, w, window_strides=(1, 1),
        padding=[(padding, padding), (padding, padding)],
        rhs_dilation=(dilation, dilation),
        dimension_numbers=("NCHW", "OIHW", "NCHW"),
        precision=jax.lax.Precision.HIGHEST)
    y = y + bias[None, :, None, None]
    inv = gamma / jnp.sqrt(run_var + eps)
    y = (y - run_mean[None, :, None, None]) * inv[None, :, None, None] \
        + beta[None, :, None, None]
    return jnp.maximum(y, 0.0)


if __name__ == "__main__":
    def _run_case(key, B, Cin, Cout, H, W, K, padding, dilation, eps=1e-5):
        kx, kw, kb, kg, kbe, km, kv = jax.random.split(key, 7)
        x = jax.random.normal(kx, (B, Cin, H, W), dtype=jnp.float32)
        w = jax.random.normal(kw, (Cout, Cin, K, K), dtype=jnp.float32) * 0.2
        bias = jax.random.normal(kb, (Cout,), dtype=jnp.float32) * 0.1
        gamma = 1.0 + 0.1 * jax.random.normal(kg, (Cout,), dtype=jnp.float32)
        beta = 0.1 * jax.random.normal(kbe, (Cout,), dtype=jnp.float32)
        run_mean = 0.1 * jax.random.normal(km, (Cout,), dtype=jnp.float32)
        run_var = jnp.abs(jax.random.normal(kv, (Cout,), dtype=jnp.float32)) + 0.5

        out = conv_bn_relu_2d(x, w, bias, gamma, beta, run_mean, run_var,
                              padding=padding, dilation=dilation, eps=eps)
        out = jax.block_until_ready(out)

        # Reference with bf16-rounded inputs (the kernel feeds the MXU in bf16).
        xq = x.astype(jnp.bfloat16).astype(jnp.float32)
        wq = w.astype(jnp.bfloat16).astype(jnp.float32)
        ref = _reference(xq, wq, bias, gamma, beta, run_mean, run_var,
                         padding=padding, dilation=dilation, eps=eps)
        assert out.shape == ref.shape, (out.shape, ref.shape)
        err = float(jnp.max(jnp.abs(out - ref)))
        assert jnp.allclose(out, ref, atol=2e-3, rtol=2e-3), \
            f"mismatch, max abs err {err}"
        return out.shape

    key = jax.random.PRNGKey(0)
    k1, k2 = jax.random.split(key)
    s1 = _run_case(k1, B=2, Cin=4, Cout=8, H=16, W=16, K=3, padding=1, dilation=1)
    assert s1 == (2, 8, 16, 16), s1
    # Dilated branch (the "_D" in ConvBn2d_D): dilation=2, padding=2 keeps H, W.
    s2 = _run_case(k2, B=2, Cin=4, Cout=8, H=16, W=16, K=3, padding=2, dilation=2)
    assert s2 == (2, 8, 16, 16), s2

    print("KERNEL_OK")
</pallas_src>

<mosaic_0001>
module attributes {stable_mosaic.version = 11 : i64} {
  func.func @_conv_bn_relu_kernel(%arg0: i32, %arg1: i32, %arg2: memref<1x16x384xbf16, #tpu.memory_space<vmem>>, %arg3: memref<1x16x128xbf16, #tpu.memory_space<vmem>>, %arg4: memref<8x144xbf16, #tpu.memory_space<vmem>>, %arg5: memref<8x1xf32, #tpu.memory_space<vmem>>, %arg6: memref<8x1xf32, #tpu.memory_space<vmem>>, %arg7: memref<1x8x384xf32, #tpu.memory_space<vmem>>) attributes {dimension_semantics = [#tpu.dimension_semantics<parallel>, #tpu.dimension_semantics<parallel>], iteration_bounds = array<i64: 2, 1>, scalar_prefetch = 0 : i64, scratch_operands = 0 : i64, tpu.core_type = #tpu.core_type<tc>, window_params = [{transform_indices = @transform_0, window_bounds = array<i64: 1, 16, 384>}, {transform_indices = @transform_1, window_bounds = array<i64: 1, 16, 128>}, {pipeline_mode = #tpu.pipeline_mode<synchronous>, transform_indices = @transform_2, window_bounds = array<i64: 8, 144>}, {pipeline_mode = #tpu.pipeline_mode<synchronous>, transform_indices = @transform_3, window_bounds = array<i64: 8, 1>}, {pipeline_mode = #tpu.pipeline_mode<synchronous>, transform_indices = @transform_4, window_bounds = array<i64: 8, 1>}, {transform_indices = @transform_5, window_bounds = array<i64: 1, 8, 384>}]} {
    %c0 = arith.constant 0 : index
    %c0_0 = arith.constant 0 : index
    %c0_1 = arith.constant 0 : index
    %0 = vector.load %arg2[%c0, %c0_0, %c0_1] : memref<1x16x384xbf16, #tpu.memory_space<vmem>>, vector<1x16x384xbf16>
    %1 = vector.shape_cast %0 : vector<1x16x384xbf16> to vector<16x384xbf16>
    %c0_2 = arith.constant 0 : index
    %c0_3 = arith.constant 0 : index
    %c0_4 = arith.constant 0 : index
    %2 = vector.load %arg3[%c0_2, %c0_3, %c0_4] : memref<1x16x128xbf16, #tpu.memory_space<vmem>>, vector<1x16x128xbf16>
    %3 = vector.shape_cast %2 : vector<1x16x128xbf16> to vector<16x128xbf16>
    %4 = tpu.concatenate %1, %3 in 1 : vector<16x384xbf16>, vector<16x128xbf16> -> vector<16x512xbf16>
    %c0_5 = arith.constant 0 : index
    %c0_6 = arith.constant 0 : index
    %5 = vector.load %arg4[%c0_5, %c0_6] : memref<8x144xbf16, #tpu.memory_space<vmem>>, vector<8x144xbf16>
    %c0_7 = arith.constant 0 : index
    %c0_8 = arith.constant 0 : index
    %6 = vector.load %arg5[%c0_7, %c0_8] : memref<8x1xf32, #tpu.memory_space<vmem>>, vector<8x1xf32>
    %c0_9 = arith.constant 0 : index
    %c0_10 = arith.constant 0 : index
    %7 = vector.load %arg6[%c0_9, %c0_10] : memref<8x1xf32, #tpu.memory_space<vmem>>, vector<8x1xf32>
    %8 = vector.extract_strided_slice %4 {offsets = [0, 0], sizes = [16, 384], strides = [1, 1]} : vector<16x512xbf16> to vector<16x384xbf16>
    %9 = vector.extract_strided_slice %4 {offsets = [0, 1], sizes = [16, 384], strides = [1, 1]} : vector<16x512xbf16> to vector<16x384xbf16>
    %10 = vector.extract_strided_slice %4 {offsets = [0, 2], sizes = [16, 384], strides = [1, 1]} : vector<16x512xbf16> to vector<16x384xbf16>
    %11 = vector.extract_strided_slice %4 {offsets = [0, 18], sizes = [16, 384], strides = [1, 1]} : vector<16x512xbf16> to vector<16x384xbf16>
    %12 = vector.extract_strided_slice %4 {offsets = [0, 19], sizes = [16, 384], strides = [1, 1]} : vector<16x512xbf16> to vector<16x384xbf16>
    %13 = vector.extract_strided_slice %4 {offsets = [0, 20], sizes = [16, 384], strides = [1, 1]} : vector<16x512xbf16> to vector<16x384xbf16>
    %14 = vector.extract_strided_slice %4 {offsets = [0, 36], sizes = [16, 384], strides = [1, 1]} : vector<16x512xbf16> to vector<16x384xbf16>
    %15 = vector.extract_strided_slice %4 {offsets = [0, 37], sizes = [16, 384], strides = [1, 1]} : vector<16x512xbf16> to vector<16x384xbf16>
    %16 = vector.extract_strided_slice %4 {offsets = [0, 38], sizes = [16, 384], strides = [1, 1]} : vector<16x512xbf16> to vector<16x384xbf16>
    %17 = tpu.concatenate %8, %9, %10, %11, %12, %13, %14, %15, %16 in 0 : vector<16x384xbf16>, vector<16x384xbf16>, vector<16x384xbf16>, vector<16x384xbf16>, vector<16x384xbf16>, vector<16x384xbf16>, vector<16x384xbf16>, vector<16x384xbf16>, vector<16x384xbf16> -> vector<144x384xbf16>
    %cst = arith.constant dense<0.000000e+00> : vector<8x384xf32>
    %18 = tpu.matmul %5, %17, %cst {dimension_numbers = #tpu.dot_dimension_numbers<[1], [0], [0], [1], [0, 0, 1, 1], [], []>} : vector<8x144xbf16>, vector<144x384xbf16>, vector<8x384xf32> -> vector<8x384xf32>
    %19 = vector.broadcast %6 : vector<8x1xf32> to vector<8x384xf32>
    %20 = arith.mulf %18, %19 : vector<8x384xf32>
    %21 = vector.broadcast %7 : vector<8x1xf32> to vector<8x384xf32>
    %22 = arith.addf %20, %21 : vector<8x384xf32>
    %cst_11 = arith.constant 0.000000e+00 : f32
    %23 = vector.broadcast %cst_11 : f32 to vector<8x384xf32>
    %24 = arith.maximumf %22, %23 : vector<8x384xf32>
    %c0_12 = arith.constant 0 : index
    %c0_13 = arith.constant 0 : index
    %c0_14 = arith.constant 0 : index
    %25 = vector.load %arg7[%c0_12, %c0_13, %c0_14] : memref<1x8x384xf32, #tpu.memory_space<vmem>>, vector<1x8x384xf32>
    %26 = vector.shape_cast %25 : vector<1x8x384xf32> to vector<8x384xf32>
    %27 = vector.shape_cast %24 : vector<8x384xf32> to vector<1x8x384xf32>
    tpu.vector_store %arg7[%c0_12, %c0_13, %c0_14], %27 {strides = array<i32>} : memref<1x8x384xf32, #tpu.memory_space<vmem>>, vector<1x8x384xf32>,
    return
  }
  func.func @transform_0(%arg0: i32, %arg1: i32) -> (i32, i32, i32) {
    %c0_i32 = arith.constant 0 : i32
    %c0_i32_0 = arith.constant 0 : i32
    return %arg0, %c0_i32, %arg1 : i32, i32, i32
  }
  func.func @transform_1(%arg0: i32, %arg1: i32) -> (i32, i32, i32) {
    %c1_i32 = arith.constant 1 : i32
    %0 = arith.addi %arg1, %c1_i32 : i32
    %c3_i32 = arith.constant 3 : i32
    %1 = arith.muli %0, %c3_i32 : i32
    %c0_i32 = arith.constant 0 : i32
    %c0_i32_0 = arith.constant 0 : i32
    return %arg0, %c0_i32, %1 : i32, i32, i32
  }
  func.func @transform_2(%arg0: i32, %arg1: i32) -> (i32, i32) {
    %c0_i32 = arith.constant 0 : i32
    %c0_i32_0 = arith.constant 0 : i32
    %c0_i32_1 = arith.constant 0 : i32
    return %c0_i32, %c0_i32_0 : i32, i32
  }
  func.func @transform_3(%arg0: i32, %arg1: i32) -> (i32, i32) {
    %c0_i32 = arith.constant 0 : i32
    %c0_i32_0 = arith.constant 0 : i32
    %c0_i32_1 = arith.constant 0 : i32
    return %c0_i32, %c0_i32_0 : i32, i32
  }
  func.func @transform_4(%arg0: i32, %arg1: i32) -> (i32, i32) {
    %c0_i32 = arith.constant 0 : i32
    %c0_i32_0 = arith.constant 0 : i32
    %c0_i32_1 = arith.constant 0 : i32
    return %c0_i32, %c0_i32_0 : i32, i32
  }
  func.func @transform_5(%arg0: i32, %arg1: i32) -> (i32, i32, i32) {
    %c0_i32 = arith.constant 0 : i32
    %c0_i32_0 = arith.constant 0 : i32
    return %arg0, %c0_i32, %arg1 : i32, i32, i32
  }
}

</mosaic_0001>

<bundles_post_ra>
// kernel: tpu_custom_call.1
= control target key start
LH: loop header
LB: loop body
LE: loop exit
PB: predicated region body
PF: predicated region fallthrough
CT: control target
= control target key end

     0   :  { %s1282_s0 = inlined_call_operand.hbm [shape: bf16[2,16,522], index: 0, kind: input, shape index: {}]   ;;  %s1283_s1 = inlined_call_operand.hbm [shape: bf16[2,16,522], index: 1, kind: input, shape index: {}]   ;;  %s1284_s2 = inlined_call_operand.vmem [shape: bf16[8,144], index: 2, kind: input, shape index: {}]   ;;  %s1285_s3 = inlined_call_operand.vmem [shape: f32[8,1], index: 3, kind: input, shape index: {}]   ;;  %s1286_s4 = inlined_call_operand.vmem [shape: f32[8,1], index: 4, kind: input, shape index: {}]   ;;  %s1287_s5 = inlined_call_operand.hbm [shape: f32[2,8,384], index: 5, kind: output, shape index: {}]  }
   0x1   :  { %1291 = sst [smem:[#allocation13_spill]] %s1282_s0 }
   0x2   :  { %10 = vsyncpa [#allocation3], 0 }
   0x3   :  { %12 = vsyncpa [#allocation3 + $0x1], 0 }
   0x4   :  { %13 = vsyncpa [#allocation6], 0 }
   0x5   :  { %15 = vsyncpa [#allocation6 + $0x1], 0 }
   0x6   :  { %16 = vsyncpa [#allocation4], 0 }
   0x7   :  { %18 = vsyncpa [#allocation4 + $0x1], 0  ;;  %s1027_s18 = smov 0   ;;  %s1029_s19 = smov 0  }
   0x8   :  { %s1031_s20 = smov 0   ;;  %s1033_s21 = smov 0  }
   0x9   :  { %s1035_s22 = smov 0   ;;  %s1037_s23 = smov 0  }
   0xa LB: > { %s717_s24 = sadd.s32 4294967295, %s978_s23   ;;  %s718_s25 = sadd.s32 4294967294, %s978_s23   ;;  %s978_s23 = sphi %s1037_s23, %s24_s23   ;;  %s974_s22 = sphi %s1035_s22, %s1311_s22   ;;  %s970_s21 = sphi %s1033_s21, %s1310_s21   ;;  %s966_s20 = sphi %s1031_s20, %s1309_s20   ;;  %s962_s19 = sphi %s1029_s19, %s1308_s19   ;;  %s958_s18 = sphi %s1027_s18, %s1307_s18  }
   0xb   : > { %s36_s26 = sadd.s32 1, %s974_s22  ;;  %s45_s27 = sadd.s32 1, %s966_s20 }
   0xc   : > { %p38_p0 = scmp.ge.s32.totalorder %s36_s26, 2  ;;  %p52_p1 = scmp.ne.s32.totalorder %s966_s20, %s962_s19 }
   0xd   : > { %p53_p2 = scmp.eq.s32.totalorder %s978_s23, 0  ;;  %p58_p3 = scmp.ne.s32.totalorder %s962_s19, %s958_s18 }
   0xe   : > { %s1313_s26 = smov (%p38_p0, %s36_s26), 0  ;;  %p59_p5 = scmp.eq.s32.totalorder %s717_s24, 0 }
   0xf   : > { %1292 = sst [smem:[#allocation11_spill]] %s1313_s26  ;;  %p1068_p4 = por %p53_p2, %p52_p1 }
  0x10   : > { %s40_s29 = ssub.s32 %s974_s22, %s1313_s26  ;;  %p179_p6 = scmp.eq.s32.totalorder %s717_s24, 1 }
  0x11   : > { %p43_p7 = scmp.eq.s32.totalorder %s40_s29, 0  ;;  %p1074_p8 = por %p59_p5, %p58_p3 }
  0x12   : > { %p1078_p9 = por %p179_p6, %p52_p1  ;;  %p185_p10 = scmp.eq.s32.totalorder %s718_s25, 1 }
  0x13   : > { %s1294_s30 = scalar_select %p1074_p8, 1, 0 }
  0x14   : > { %s1295_s6 = scalar_select %p1078_p9, 1, 0 }
  0x15   : > { %s1083_s7 = scalar_select %p43_p7, %s966_s20, %s45_s27  }
  0x16   : > { %p1085_p11 = por %p185_p10, %p58_p3  ;;  %p758_p13 = scmp.lt.s32.totalorder %s978_s23, 2 }
  0x17   : > { %1296 = sst [smem:[#allocation12_spill]] %s1083_s7  ;;  %s1092_s9 = sand.u32 1, %s966_s20  }
  0x18   : > { %s1297_s8 = scalar_select %p1085_p11, 1, 0 }
  0x19   : > { %s737_s10 = smul.u32 24, %s1092_s9  ;;  %p1098_p0 = pnand %p758_p13, %p1068_p4 }
  0x1a   : > { %s738_s11 = smul.u32 640, %s974_s22  ;;  %s1299_s0 = sld [smem:[#allocation13_spill]] }
  0x1b   : > { %s218_s16 = scalar_lea.vmem [#allocation2], %s737_s10  ;;  %s215_s24 = scalar_lea.sflag [#allocation3], %s1092_s9 }
  0x1c   : > { %s234_s17 = sshll.u32 %s218_s16, 4  ;;  %p833_p2 = pneg %p1098_p0  ;;  %s1109_s17 = int_to_ptr.vmem [resolvable:$true] %s234_s17 }
  0x20   : > { %s1107_s15 = scalar_lea.hbm %s1299_s0, %s738_s11  ;;  %s836_s29 = scalar_lea.hbm %s1299_s0, 1280 }
  0x21   : > { %s831_s25 = scalar_lea.hbm %s1107_s15, 384  ;;  %p837_p5 = scmp.lt.u32.totalorder %s1107_s15, %s1299_s0 }
  0x22   : > { %p832_p1 = scmp.ne.s32.totalorder %s1107_s15, %s831_s25  ;;  %p838_p6 = scmp.lt.u32.totalorder %s836_s29, %s831_s25 }
  0x23   : > { %p840_p10 = scmp.lt.u32.totalorder %s831_s25, %s1107_s15 }
  0x24   : > { %p834_p3 = pnand %p833_p2, %p832_p1  ;;  %p839_p7 = por %p838_p6, %p837_p5 }
  0x26   : > { %p835_p4 = pneg %p834_p3  ;;  %p841_p13 = por %p840_p10, %p839_p7 }
  0x28   : > { %p842_p12 = pnand %p841_p13, %p835_p4 }
  0x2a   : > { %845 = shalt.err (!%p842_p12)
}
  0x2b   : > { %s846_s10 = scalar_lea.vmem %s1109_s17, 384  ;;  %s980_s16 = smov [#allocation2]  }
  0x2c   : > { %p847_p1 = scmp.ne.s32.totalorder %s1109_s17, %s846_s10  ;;  %s851_s27 = sshll.u32 %s980_s16, 4  ;;  %s852_s27 = int_to_ptr.vmem [resolvable:$false] %s851_s27 }
  0x2d   : > { %s853_s28 = scalar_lea.vmem %s852_s27, 768  ;;  %p854_p9 = scmp.lt.s32.totalorder %s1109_s17, %s852_s27 }
  0x2e   : > { %p849_p3 = pnand %p847_p1, %p833_p2  ;;  %p855_p5 = scmp.lt.s32.totalorder %s853_s28, %s846_s10 }
  0x30   : > { %p850_p11 = pneg %p849_p3  ;;  %p856_p6 = por %p855_p5, %p854_p9 }
  0x32   : > { %p857_p7 = pnand %p856_p6, %p850_p11 }
  0x34   : > { %860 = shalt.err (!%p857_p7)
}
  0x35   : > { %s981_s25 = smov 320   ;;  %s982_s29 = smov 192  }
  0x36   : > { %s983_s13 = smov 12   ;;  %p724_p9 = scmp.ge.s32.totalorder %s978_s23, 1 }
  0x37   : > { %750 = dma.hbm_to_vmem [thread:$0]  (!%p1098_p0), %s1107_s15, 384, %s1109_s17, %s215_s24, %s981_s25, %s982_s29, %s983_s13  }
  0x38   : > { %p266_p11 = scmp.lt.s32.totalorder %s978_s23, 3  ;;  %s722_s14 = sshll.u32 %s1092_s9, 3 }
  0x39   : > { %s648_s28 = scalar_lea.hbm %s1283_s1, %s738_s11  ;;  %s248_s0 = scalar_lea.vmem [#allocation5], %s722_s14 }
  0x3a   : > { %p1143_p12 = pnand %p724_p9, %p266_p11  ;;  %s258_s26 = sshll.u32 %s248_s0, 4  ;;  %s1154_s26 = int_to_ptr.vmem [resolvable:$true] %s258_s26 }
  0x3b   : > { %s1152_s7 = scalar_lea.hbm %s648_s28, 192  ;;  %s245_s15 = scalar_lea.sflag [#allocation6], %s1092_s9 }
  0x3c   : > { %s891_s17 = scalar_lea.hbm %s648_s28, 320  ;;  %s866_s11 = scalar_lea.hbm %s1283_s1, 1280 }
  0x3d   : > { %p862_p4 = scmp.ne.s32.totalorder %s1152_s7, %s891_s17  ;;  %p867_p1 = scmp.lt.u32.totalorder %s1152_s7, %s1283_s1 }
  0x3e   : > { %p868_p3 = scmp.lt.u32.totalorder %s866_s11, %s891_s17  ;;  %p870_p6 = scmp.lt.u32.totalorder %s891_s17, %s1152_s7 }
  0x3f   : > { %p864_p10 = pnand %p862_p4, %p833_p2 }
  0x40   : > { %p869_p5 = por %p868_p3, %p867_p1 }
  0x41   : > { %p865_p13 = pneg %p864_p10 }
  0x42   : > { %p871_p7 = por %p870_p6, %p869_p5 }
  0x44   : > { %p872_p9 = pnand %p871_p7, %p865_p13 }
  0x46   : > { %875 = shalt.err (!%p872_p9)
}
  0x47   : > { %s876_s14 = scalar_lea.vmem %s1154_s26, 128  ;;  %s984_s16 = smov [#allocation5]  }
  0x48   : > { %p877_p11 = scmp.ne.s32.totalorder %s1154_s26, %s876_s14  ;;  %s881_s27 = sshll.u32 %s984_s16, 4  ;;  %s882_s27 = int_to_ptr.vmem [resolvable:$false] %s881_s27 }
  0x49   : > { %s883_s28 = scalar_lea.vmem %s882_s27, 256  ;;  %p884_p8 = scmp.lt.s32.totalorder %s1154_s26, %s882_s27 }
  0x4a   : > { %p879_p4 = pnand %p877_p11, %p833_p2  ;;  %p885_p1 = scmp.lt.s32.totalorder %s883_s28, %s876_s14 }
  0x4c   : > { %p880_p10 = pneg %p879_p4  ;;  %p886_p3 = por %p885_p1, %p884_p8 }
  0x4e   : > { %p887_p5 = pnand %p886_p3, %p880_p10 }
  0x50   : > { %890 = shalt.err (!%p887_p5)
}
  0x51   : > { %s985_s17 = smov 64   ;;  %s986_s24 = smov 4  }
  0x52   : > { %753 = dma.hbm_to_vmem [thread:$0]  (!%p1098_p0), %s1152_s7, 128, %s1154_s26, %s245_s15, %s981_s25, %s985_s17, %s986_s24  }
  0x53   : > { %270 = sbr.rel (%p1143_p12) target bundleno = 508 (0x1fc), region = 40  ;;  %s1185_s29 = sand.u32 (!%p1143_p12), 1, %s962_s19  }
  0x54   : > { %s739_s11 = smul.u32 (!%p1143_p12), 24, %s1185_s29  ;;  %s273_s13 = scalar_lea.sflag (!%p1143_p12), [#allocation3], %s1185_s29 }
  0x55   : > { %p1301_p8 = scmp.ne.s32.totalorder (!%p1143_p12), %s1294_s30, 0 }
  0x56   : > { %s276_s0 = scalar_lea.vmem (!%p1143_p12), [#allocation2], %s739_s11 }
  0x5a   : > { %945 = dma.done.wait (%p1301_p8), %s273_s13, 384  }
  0x5b   : > { %947 = vsyncadd (%p1301_p8), %s273_s13, 4294966912  ;;  %s725_s26 = sshll.u32 %s1185_s29, 3  ;;  %s282_s7 = scalar_lea.sflag [#allocation6], %s1185_s29 }
  0x5c   : > { %s285_s9 = scalar_lea.vmem [#allocation5], %s725_s26 }
  0x5d   : > { %949 = dma.done.wait (%p1301_p8), %s282_s7, 128  }
  0x5e   : > { %951 = vsyncadd (%p1301_p8), %s282_s7, 4294967168  ;;  %v987_v0 = vmov 0   ;;  %v824_v1 = vld [vmem:[%s276_s0 + $0x4] ss:$12 sps:$4 sm:$0xff]   ;;  %v826_v2 = vld [vmem:[%s276_s0] ss:$12 sps:$4 sm:$0xff]  }
  0x5f   : > { %527 = vmatprep.subr.bf16.mxu1 %v987_v0  ;;  %822 = vset.pattern.permute.xlu0 %v987_v0  ;;  %s988_s12 = smov 127   ;;  %v827_v3 = vld [vmem:[%s276_s0 + $0x8] ss:$12 sps:$4 sm:$0xff]   ;;  %s989_s30 = smov 126   ;;  %vm482_vm0 = vcmask 130048   ;;  %vm364_vm1 = vcmask 1039360  }
  0x60   : > { %823 = vset.pattern.permute.xlu1 %v987_v0  ;;  %358 = vrot.lane.b32.xlu0 %v824_v1, %s988_s12  ;;  %v828_v4 = vld [vmem:[%s285_s9] sm:$0xff]   ;;  %s990_s25 = smov 110   ;;  %s991_s10 = smov 109   ;;  %v1208_v5 = vld [vmem:[%s1284_s2] sm:$0xff]  ;;  %vm379_vm2 = vcmask 1031168   ;;  %vm394_vm3 = vcmask 900096  }
  0x61   : > { %486 = vmatprep.subr.bf16.mxu0 %v824_v1  ;;  %356 = vrot.lane.b32.xlu1 %v826_v2, %s988_s12  ;;  %s992_s15 = smov 108   ;;  %s993_s14 = smov 92   ;;  %v731_v6 = vcombine.high %v1208_v5, %v1208_v5  ;;  %v354_v7 = vld [vmem:[%s1285_s3] sm:$0xff]  ;;  %vm409_vm4 = vcmask 891904   ;;  %vm424_vm5 = vcmask 883712   ;;  %vm439_vm6 = vcmask 752640  }
  0x62   : > { %487 = vmatpush1.bf16.msra.mxu0 %v826_v2  ;;  %528 = vmatpush1.bf16.msra.mxu1 %v827_v3  ;;  %s994_s16 = smov 91   ;;  %s995_s17 = smov 90   ;;  %v355_v8 = vld [vmem:[%s1286_s4] sm:$0xff]  ;;  %vm454_vm7 = vcmask 744448   ;;  %vm469_vm8 = vcmask 736256  }
  0x63   : > { %529 = vmatprep.subr.bf16.mxu1 %v987_v0  ;;  %732 = vmatprep.mubr.msk.bf16.mxu0 %vm482_vm0, %v731_v6  ;;  %s740_s7 = smul.u32 384, %s970_s21  ;;  %s316_s9 = scalar_lea.vmem [#allocation7], %s739_s11 }
  0x64   : > { %360 = vrot.lane.b32.xlu0 %v827_v3, %s988_s12  ;;  %733 = vmatprep.mubr.msk.bf16.mxu1 %vm482_vm0, %v731_v6  ;;  %s590_s21 = scalar_lea.sflag [#allocation4], %s1185_s29  ;;  %p1302_p2 = scmp.ne.s32.totalorder %s1295_s6, 0 }
  0x65   : > { %362 = vrot.lane.b32.xlu1 %v828_v4, %s988_s12  ;;  %s606_s12 = sshll.u32 %s316_s9, 4  ;;  %s1235_s12 = int_to_ptr.vmem [resolvable:$true] %s606_s12 }
  0x66   : > { %s892_s11 = scalar_lea.vmem %s1235_s12, 384 }
  0x67   : > { %p893_p0 = scmp.ne.s32.totalorder %s1235_s12, %s892_s11 }
  0x68   : > { %373 = vrot.lane.b32.xlu0 %v824_v1, %s989_s30 }
  0x69   : > { %375 = vrot.lane.b32.xlu1 %v827_v3, %s989_s30  ;;  %p894_p12 = pnand %p893_p0, %p1302_p2 }
  0x6b   : > { %p895_p13 = pneg %p894_p12 }
  0x6c   : > { %371 = vrot.lane.b32.xlu0 %v826_v2, %s989_s30 }
  0x6d   : > { %377 = vrot.lane.b32.xlu1 %v828_v4, %s989_s30 }
  0x70   : > { %388 = vrot.lane.b32.xlu0 %v824_v1, %s990_s25 }
  0x71   : > { %390 = vrot.lane.b32.xlu1 %v827_v3, %s990_s25 }
  0x74   : > { %386 = vrot.lane.b32.xlu0 %v826_v2, %s990_s25 }
  0x75   : > { %392 = vrot.lane.b32.xlu1 %v828_v4, %s990_s25 }
  0x78   : > { %403 = vrot.lane.b32.xlu0 %v824_v1, %s991_s10 }
  0x79   : > { %405 = vrot.lane.b32.xlu1 %v827_v3, %s991_s10 }
  0x7c   : > { %401 = vrot.lane.b32.xlu0 %v826_v2, %s991_s10 }
  0x7d   : > { %407 = vrot.lane.b32.xlu1 %v828_v4, %s991_s10  ;;  %s1233_s10 = scalar_lea.hbm %s1287_s5, %s740_s7 }
  0x80   : > { %418 = vrot.lane.b32.xlu0 %v824_v1, %s992_s15 }
  0x81   : > { %420 = vrot.lane.b32.xlu1 %v827_v3, %s992_s15 }
  0x84   : > { %416 = vrot.lane.b32.xlu0 %v826_v2, %s992_s15 }
  0x85   : > { %422 = vrot.lane.b32.xlu1 %v828_v4, %s992_s15  ;;  %s996_s15 = smov [#allocation7]  }
  0x88   : > { %433 = vrot.lane.b32.xlu0 %v824_v1, %s993_s14 }
  0x89   : > { %435 = vrot.lane.b32.xlu1 %v827_v3, %s993_s14 }
  0x8c   : > { %431 = vrot.lane.b32.xlu0 %v826_v2, %s993_s14 }
  0x8d   : > { %437 = vrot.lane.b32.xlu1 %v828_v4, %s993_s14  ;;  %s896_s14 = sshll.u32 %s996_s15, 4  ;;  %s897_s14 = int_to_ptr.vmem [resolvable:$false] %s896_s14 }
  0x8e   : > { %p899_p6 = scmp.lt.s32.totalorder %s1235_s12, %s897_s14 }
  0x90   : > { %448 = vrot.lane.b32.xlu0 %v824_v1, %s994_s16 }
  0x91   : > { %450 = vrot.lane.b32.xlu1 %v827_v3, %s994_s16 }
  0x94   : > { %446 = vrot.lane.b32.xlu0 %v826_v2, %s994_s16 }
  0x95   : > { %452 = vrot.lane.b32.xlu1 %v828_v4, %s994_s16  ;;  %s898_s16 = scalar_lea.vmem %s897_s14, 768 }
  0x96   : > { %p900_p7 = scmp.lt.s32.totalorder %s898_s16, %s892_s11 }
  0x98   : > { %463 = vrot.lane.b32.xlu0 %v824_v1, %s995_s17  ;;  %v730_v1 = vcombine.low %v1208_v5, %v1208_v5  ;;  %p901_p9 = por %p900_p7, %p899_p6 }
  0x99   : > { %465 = vrot.lane.b32.xlu1 %v827_v3, %s995_s17 }
  0x9a   : > { %p902_p11 = pnand %p901_p9, %p895_p13 }
  0x9c   : > { %461 = vrot.lane.b32.xlu0 %v826_v2, %s995_s17 }
  0x9d   : > { %467 = vrot.lane.b32.xlu1 %v828_v4, %s995_s17 }
  0xa0   : > { %569 = vperm.xlu0 %822, %v354_v7  }
  0xa1   : > { %577 = vperm.xlu1 %823, %v355_v8  }
  0xd2   : > { %v359_v9 = vpop.permute.xlu0 %358 }
  0xd3   : > { %v357_v10 = vpop.permute.xlu1 %356 }
  0xd4   : > { %v365_v15 = vsel %vm364_vm1, %v357_v10, %v359_v9 }
  0xd6   : > { %v361_v11 = vpop.permute.xlu0 %360 }
  0xd7   : > { %v363_v12 = vpop.permute.xlu1 %362  ;;  %v366_v13 = vsel %vm364_vm1, %v359_v9, %v361_v11 }
  0xd8   : > { %488 = vmatprep.subr.bf16.mxu0 %v366_v13  ;;  %v367_v14 = vsel %vm364_vm1, %v361_v11, %v363_v12 }
  0xd9   : > { %530 = vmatpush1.bf16.msra.mxu1 %v367_v14  ;;  %489 = vmatpush1.bf16.msra.mxu0 %v365_v15 }
  0xda   : > { %v374_v16 = vpop.permute.xlu0 %373  ;;  %531 = vmatprep.subr.bf16.mxu1 %v987_v0 }
  0xdb   : > { %v376_v17 = vpop.permute.xlu1 %375 }
  0xdc   : > { %v381_v18 = vsel %vm379_vm2, %v374_v16, %v376_v17 }
  0xdd   : > { %490 = vmatprep.subr.bf16.mxu0 %v381_v18 }
  0xde   : > { %v372_v19 = vpop.permute.xlu0 %371 }
  0xdf   : > { %v378_v20 = vpop.permute.xlu1 %377  ;;  %v380_v21 = vsel %vm379_vm2, %v372_v19, %v374_v16 }
  0xe0   : > { %491 = vmatpush1.bf16.msra.mxu0 %v380_v21  ;;  %v382_v22 = vsel %vm379_vm2, %v376_v17, %v378_v20 }
  0xe1   : > { %532 = vmatpush1.bf16.msra.mxu1 %v382_v22 }
  0xe2   : > { %v389_v23 = vpop.permute.xlu0 %388  ;;  %533 = vmatprep.subr.bf16.mxu1 %v987_v0 }
  0xe3   : > { %v391_v24 = vpop.permute.xlu1 %390 }
  0xe4   : > { %v396_v25 = vsel %vm394_vm3, %v389_v23, %v391_v24 }
  0xe5   : > { %492 = vmatprep.subr.bf16.mxu0 %v396_v25 }
  0xe6   : > { %v387_v26 = vpop.permute.xlu0 %386 }
  0xe7   : > { %v393_v27 = vpop.permute.xlu1 %392  ;;  %v395_v28 = vsel %vm394_vm3, %v387_v26, %v389_v23 }
  0xe8   : > { %493 = vmatpush1.bf16.msra.mxu0 %v395_v28  ;;  %v397_v29 = vsel %vm394_vm3, %v391_v24, %v393_v27 }
  0xe9   : > { %534 = vmatpush1.bf16.msra.mxu1 %v397_v29 }
  0xea   : > { %v404_v30 = vpop.permute.xlu0 %403  ;;  %535 = vmatprep.subr.bf16.mxu1 %v987_v0 }
  0xeb   : > { %v406_v31 = vpop.permute.xlu1 %405 }
  0xec   : > { %v411_v32 = vsel %vm409_vm4, %v404_v30, %v406_v31 }
  0xed   : > { %494 = vmatprep.subr.bf16.mxu0 %v411_v32 }
  0xee   : > { %v402_v33 = vpop.permute.xlu0 %401 }
  0xef   : > { %v408_v34 = vpop.permute.xlu1 %407  ;;  %v410_v35 = vsel %vm409_vm4, %v402_v33, %v404_v30 }
  0xf0   : > { %495 = vmatpush1.bf16.msra.mxu0 %v410_v35  ;;  %v412_v36 = vsel %vm409_vm4, %v406_v31, %v408_v34 }
  0xf1   : > { %536 = vmatpush1.bf16.msra.mxu1 %v412_v36 }
  0xf2   : > { %v419_v37 = vpop.permute.xlu0 %418  ;;  %537 = vmatprep.subr.bf16.mxu1 %v987_v0 }
  0xf3   : > { %v421_v38 = vpop.permute.xlu1 %420 }
  0xf4   : > { %v426_v39 = vsel %vm424_vm5, %v419_v37, %v421_v38 }
  0xf5   : > { %496 = vmatprep.subr.bf16.mxu0 %v426_v39 }
  0xf6   : > { %v417_v40 = vpop.permute.xlu0 %416 }
  0xf7   : > { %v423_v41 = vpop.permute.xlu1 %422  ;;  %v425_v42 = vsel %vm424_vm5, %v417_v40, %v419_v37 }
  0xf8   : > { %497 = vmatpush1.bf16.msra.mxu0 %v425_v42  ;;  %v427_v43 = vsel %vm424_vm5, %v421_v38, %v423_v41 }
  0xf9   : > { %538 = vmatpush1.bf16.msra.mxu1 %v427_v43 }
  0xfa   : > { %v434_v44 = vpop.permute.xlu0 %433  ;;  %539 = vmatprep.subr.bf16.mxu1 %v987_v0 }
  0xfb   : > { %v436_v45 = vpop.permute.xlu1 %435 }
  0xfc   : > { %v441_v46 = vsel %vm439_vm6, %v434_v44, %v436_v45 }
  0xfd   : > { %498 = vmatprep.subr.bf16.mxu0 %v441_v46 }
  0xfe   : > { %v432_v47 = vpop.permute.xlu0 %431 }
  0xff   : > { %v438_v48 = vpop.permute.xlu1 %437  ;;  %v440_v49 = vsel %vm439_vm6, %v432_v47, %v434_v44 }
 0x100   : > { %499 = vmatpush1.bf16.msra.mxu0 %v440_v49  ;;  %v442_v50 = vsel %vm439_vm6, %v436_v45, %v438_v48 }
 0x101   : > { %540 = vmatpush1.bf16.msra.mxu1 %v442_v50 }
 0x102   : > { %v449_v51 = vpop.permute.xlu0 %448  ;;  %541 = vmatprep.subr.bf16.mxu1 %v987_v0 }
 0x103   : > { %v451_v52 = vpop.permute.xlu1 %450 }
 0x104   : > { %v456_v53 = vsel %vm454_vm7, %v449_v51, %v451_v52 }
 0x105   : > { %500 = vmatprep.subr.bf16.mxu0 %v456_v53 }
 0x106   : > { %v447_v54 = vpop.permute.xlu0 %446 }
 0x107   : > { %v453_v55 = vpop.permute.xlu1 %452  ;;  %v455_v56 = vsel %vm454_vm7, %v447_v54, %v449_v51 }
 0x108   : > { %501 = vmatpush1.bf16.msra.mxu0 %v455_v56  ;;  %v457_v57 = vsel %vm454_vm7, %v451_v52, %v453_v55 }
 0x109   : > { %542 = vmatpush1.bf16.msra.mxu1 %v457_v57 }
 0x10a   : > { %v464_v58 = vpop.permute.xlu0 %463  ;;  %543 = vmatprep.subr.bf16.mxu1 %v987_v0 }
 0x10b   : > { %v466_v59 = vpop.permute.xlu1 %465 }
 0x10c   : > { %v471_v60 = vsel %vm469_vm8, %v464_v58, %v466_v59 }
 0x10d   : > { %502 = vmatprep.subr.bf16.mxu0 %v471_v60 }
 0x10e   : > { %v462_v61 = vpop.permute.xlu0 %461 }
 0x10f   : > { %v468_v62 = vpop.permute.xlu1 %467  ;;  %v470_v63 = vsel %vm469_vm8, %v462_v61, %v464_v58 }
 0x110   : > { %503 = vmatpush1.bf16.msra.mxu0 %v470_v63  ;;  %v472_v2 = vsel %vm469_vm8, %v466_v59, %v468_v62 }
 0x111   : > { %544 = vmatpush1.bf16.msra.mxu1 %v472_v2 }
 0x113   : > { %519 = vmatmul.mubr.bf16.vlgmr.msra.gmra.mrb[0].mxu0 %v730_v1 }
 0x114   : > { %560 = vmatmul.mubr.bf16.vlgmr.msra.gmra.mrb[0].mxu1 %v730_v1 }
 0x11f   : > { %v570_v3 = vpop.permute.xlu0 %569 }
 0x120   : > { %v578_v6 = vpop.permute.xlu1 %577 }
 0x1e6   : > { %v520_v4 = vpop.f32.mrb[0].mxu0 }
 0x1e7   : > { %v572_v0 = vmul.f32 %v570_v3, %v520_v4  ;;  %v561_v7 = vpop.f32.mrb[0].mxu1  ;;  %v522_v8 = vpop.f32.mrb[1].mxu0 }
 0x1e8   : > { %v574_v9 = vmul.f32 %v570_v3, %v561_v7  ;;  %v573_v10 = vmul.f32 %v570_v3, %v522_v8  ;;  %v563_v11 = vpop.f32.mrb[1].mxu1  ;;  %v524_v12 = vpop.f32.mrb[2].mxu0 }
 0x1e9   : > { %v564_v13 = vpop.f32.mrb[2].mxu1  ;;  %v580_v5 = vadd.f32 %v578_v6, %v572_v0  ;;  %v525_v14 = vpop.f32.mrb[3].mxu0 }
 0x1ea   : > { %v581_v15 = vadd.f32 %v578_v6, %v573_v10  ;;  %v582_v16 = vadd.f32 %v578_v6, %v574_v9  ;;  %v565_v17 = vpop.f32.mrb[3].mxu1 }
 0x1eb   : > { %v583_v18 = vmax.f32 %v580_v5, 0.0 }
 0x1ec   : > { %v584_v19 = vmax.f32 %v581_v15, 0.0  ;;  %v585_v20 = vmax.f32 %v582_v16, 0.0 }
 0x1ed   : > { %586 = vst [vmem:[%s316_s9] sm:$0xff] %v583_v18 }
 0x1ee   : > { %587 = vst [vmem:[%s316_s9 + $0x8] sm:$0xff] %v584_v19  ;;  %588 = vst [vmem:[%s316_s9 + $0x10] sm:$0xff] %v585_v20 }
 0x1ef   : > { %905 = shalt.err (!%p902_p11)
}
 0x1f0   : > { %s906_s29 = scalar_lea.hbm %s1233_s10, 384  ;;  %s910_s17 = scalar_lea.hbm %s1287_s5, 768 }
 0x1f1   : > { %p907_p4 = scmp.ne.s32.totalorder %s1233_s10, %s906_s29  ;;  %p911_p3 = scmp.lt.u32.totalorder %s1233_s10, %s1287_s5 }
 0x1f2   : > { %p912_p5 = scmp.lt.u32.totalorder %s910_s17, %s906_s29  ;;  %p914_p0 = scmp.lt.u32.totalorder %s906_s29, %s1233_s10 }
 0x1f3   : > { %p908_p10 = pnand %p907_p4, %p1302_p2 }
 0x1f4   : > { %p913_p8 = por %p912_p5, %p911_p3 }
 0x1f5   : > { %p909_p1 = pneg %p908_p10 }
 0x1f6   : > { %p915_p12 = por %p914_p0, %p913_p8 }
 0x1f8   : > { %p916_p13 = pnand %p915_p12, %p909_p1 }
 0x1fa   : > { %919 = shalt.err (!%p916_p13)
}
 0x1fb   : > { %745 = dma.vmem_to_hbm [thread:$0]  (%p1302_p2), %s1235_s12, 384, %s1233_s10, %s590_s21  }
 0x1fc PF: > { %s618_s0 = sand.u32 1, %s958_s18   ;;  %p1303_p6 = scmp.ne.s32.totalorder %s1297_s8, 0 }
 0x1fd   : > { %p1304_p7 = scmp.ge.s32.totalorder %s978_s23, 2  ;;  %s619_s26 = scalar_lea.sflag [#allocation4], %s618_s0 }
 0x1ff   : > { %p755_p9 = pnand %p1304_p7, %p1303_p6 }
 0x201   : > { %953 = dma.done.wait (!%p755_p9), %s619_s26, 384  }
 0x202   : > { %955 = vsyncadd (!%p755_p9), %s619_s26, 4294966912  ;;  %s24_s23 = sadd.s32 1, %s978_s23   ;;  %s1305_s6 = sld [smem:[#allocation12_spill]] }
 0x203   : > { %p21_p11 = scmp.ge.s32.totalorder %s24_s23, 4   ;;  %s1306_s7 = sld [smem:[#allocation11_spill]] }
 0x204   : > { %s1307_s18 = smov %s962_s19  ;;  %s1308_s19 = smov %s966_s20 }
 0x205   : > { %s1310_s21 = smov %s974_s22  ;;  %23 = sbr.rel (!%p21_p11) target bundleno = 10 (0xa), region = 98 }
 0x208   : > { %s1309_s20 = smov %s1305_s6 }
 0x209   : > { %s1311_s22 = smov %s1306_s7 }
 0x20c   :  { %624 = vsyncpa [#allocation3], 1 }
 0x20d   :  { %626 = vsyncpa [#allocation3 + $0x1], 1 }
 0x20e   :  { %627 = vsyncpa [#allocation6], 1 }
 0x20f   :  { %629 = vsyncpa [#allocation6 + $0x1], 1 }
 0x210   :  { %630 = vsyncpa [#allocation4], 1 }
 0x211   :  { %632 = vsyncpa [#allocation4 + $0x1], 1 }

</bundles_post_ra>
